<compile_context>
chip_gen: v6e
topology: v6e:2x2x1
jax: 0.10.0
libtpu: 0.0.40
codegen_flags: <defaults>
</compile_context>

<pallas_src>
import functools

import jax
import jax.numpy as jnp
from jax.experimental import pallas as pl
from jax.experimental.pallas import tpu as pltpu


def _domain_classifier_kernel(x_ref, w_ref, b_ref, y_ref, loss_ref, acc_ref,
                              *, true_b, inv_b):
    # x_ref: (TB, Din)  w_ref: (Din, C)  b_ref: (1, C)  y_ref: (TB, 1) int32
    # loss_ref: (1, 1) f32 in SMEM       acc_ref: (1,) f32 SMEM scratch
    step = pl.program_id(0)

    @pl.when(step == 0)
    def _():
        acc_ref[0] = jnp.float32(0.0)

    # Linear layer: MXU matmul (f32 accumulate) + bias broadcast.
    logits = jnp.dot(x_ref[...], w_ref[...],
                     preferred_element_type=jnp.float32) + b_ref[...]
    tb, num_classes = logits.shape

    # Numerically stable log-softmax cross entropy, reusing the shifted logits.
    m = jnp.max(logits, axis=-1, keepdims=True)                      # (TB, 1)
    shifted = logits - m                                             # (TB, C)
    sum_exp = jnp.sum(jnp.exp(shifted), axis=-1, keepdims=True)      # (TB, 1)

    class_ids = jax.lax.broadcasted_iota(jnp.int32, (tb, num_classes), 1)
    onehot = class_ids == y_ref[...]                                 # (TB, C)
    true_shifted = jnp.sum(jnp.where(onehot, shifted, 0.0),
                           axis=-1, keepdims=True)                   # (TB, 1)

    per_example = jnp.log(sum_exp) - true_shifted                    # (TB, 1)

    # Mask rows beyond the true batch (partial final block reads undefined
    # rows; the select — not a multiply — keeps any NaN/Inf out of the sum).
    row = step * tb + jax.lax.broadcasted_iota(jnp.int32, (tb, 1), 0)
    per_example = jnp.where(row < true_b, per_example, 0.0)

    acc_ref[0] = acc_ref[0] + jnp.sum(per_example)

    @pl.when(step == pl.num_programs(0) - 1)
    def _():
        # Divide by the TRUE global batch size (mean reduction).
        loss_ref[0, 0] = acc_ref[0] * jnp.float32(inv_b)


def _tile_plan(batch, din, nclasses, x_itemsize, w_itemsize, requested_block_b):
    """Pick a batch tile that fits VMEM on this generation and a vmem limit."""
    try:
        info = pltpu.get_tpu_info()
        vmem_cap = int(getattr(info, "vmem_capacity_bytes", 64 * 2**20))
    except Exception:  # CPU interpret / old runtime: assume v7x's 64 MiB (safest)
        vmem_cap = 64 * 2**20
    budget = int(0.70 * vmem_cap)

    # Resident operands (BlockSpec default double-buffers even grid-invariant ones).
    resident = 2 * (din * nclasses * w_itemsize + nclasses * 4)
    # Per batch row: double-buffered x row + y + f32 temporaries (logits/shifted/exp/...).
    per_row = 2 * (din * x_itemsize + 4) + 8 * nclasses * 4

    tb_cap = max(8, (budget - resident) // max(per_row, 1))
    tb = int(min(requested_block_b, tb_cap))
    tb = max(8, (tb // 8) * 8)

    if batch <= tb:
        tb, n_blocks = batch, 1          # single-block fast path, grid=(1,)
    else:
        n_blocks = pl.cdiv(batch, tb)    # partial final block handled in-kernel

    vmem_needed = resident + tb * per_row
    vmem_limit = int(min(vmem_cap, max(32 * 2**20, 2 * vmem_needed)))
    return tb, n_blocks, vmem_limit


def domain_classifier_loss(x, w_t, bias, y, *, block_b=512):
    """x: (B, Din), w_t: (Din, C) pre-transposed, bias: (C,), y: (B,) int -> scalar f32.

    For production sizes feed x / w_t as bfloat16 (matmul accumulates in f32);
    that halves the dominant HBM stream.
    """
    B, Din = x.shape
    C = w_t.shape[1]

    tb, n_blocks, vmem_limit = _tile_plan(
        B, Din, C, x.dtype.itemsize, w_t.dtype.itemsize, block_b)

    bias2d = bias.reshape(1, C)
    y2d = y.reshape(B, 1).astype(jnp.int32)

    kernel = functools.partial(_domain_classifier_kernel,
                               true_b=B, inv_b=1.0 / float(B))

    cost = pl.CostEstimate(
        flops=2 * B * Din * C,
        transcendentals=B * C,
        bytes_accessed=(B * Din * x.dtype.itemsize
                        + Din * C * w_t.dtype.itemsize
                        + B * 4 + C * 4 + 4),
    )

    out = pl.pallas_call(
        kernel,
        out_shape=jax.ShapeDtypeStruct((1, 1), jnp.float32),
        grid_spec=pltpu.PrefetchScalarGridSpec(
            num_scalar_prefetch=0,
            grid=(n_blocks,),
            in_specs=[
                pl.BlockSpec((tb, Din), lambda i: (i, 0)),   # x: streamed over batch
                pl.BlockSpec((Din, C), lambda i: (0, 0)),    # W^T: resident
                pl.BlockSpec((1, C), lambda i: (0, 0)),      # bias: resident
                pl.BlockSpec((tb, 1), lambda i: (i, 0)),     # y: streamed over batch
            ],
            out_specs=pl.BlockSpec(memory_space=pltpu.MemorySpace.SMEM),
            scratch_shapes=[pltpu.SMEM((1,), jnp.float32)],
        ),
        compiler_params=pltpu.CompilerParams(
            dimension_semantics=("arbitrary",),   # shared accumulator => sequential
            vmem_limit_bytes=vmem_limit),
        cost_estimate=cost,
    )(x, w_t, bias2d, y2d)
    return out[0, 0]


if __name__ == "__main__":
    # Small shapes consistent with the module: batch=20 (not a multiple of 8,
    # to exercise the unpadded partial-final-block path), input_dim=32,
    # output_dim=16 classes.
    B, INPUT_DIM, OUTPUT_DIM = 20, 32, 16

    key = jax.random.PRNGKey(0)
    kx, ky, kw, kb = jax.random.split(key, 4)

    x = jax.random.normal(kx, (B, INPUT_DIM), dtype=jnp.float32)
    y = jax.random.randint(ky, (B,), 0, OUTPUT_DIM, dtype=jnp.int32)

    # Deterministic nn.Linear-style init: U(-1/sqrt(fan_in), 1/sqrt(fan_in))
    bound = 1.0 / jnp.sqrt(jnp.float32(INPUT_DIM))
    w = jax.random.uniform(kw, (OUTPUT_DIM, INPUT_DIM), jnp.float32, -bound, bound)
    bias = jax.random.uniform(kb, (OUTPUT_DIM,), jnp.float32, -bound, bound)
    w_t = w.T  # (INPUT_DIM, OUTPUT_DIM), pre-transposed for the kernel matmul

    # Reference in plain JAX (same math as torch.nn.CrossEntropyLoss, mean reduction)
    logits_ref = x @ w_t + bias
    lse_ref = jax.nn.logsumexp(logits_ref, axis=-1)
    ref_loss = jnp.mean(lse_ref - logits_ref[jnp.arange(B), y])

    # 1) Single-block fast path (whole batch fits one VMEM tile, grid=(1,)).
    loss_single = domain_classifier_loss(x, w_t, bias, y)
    jax.block_until_ready(loss_single)
    assert jnp.allclose(loss_single, ref_loss, atol=1e-5, rtol=1e-5), (loss_single, ref_loss)

    # 2) Multi-block path with an unpadded partial final block (exercises the mask).
    loss_tiled = domain_classifier_loss(x, w_t, bias, y, block_b=8)
    jax.block_until_ready(loss_tiled)
    assert jnp.allclose(loss_tiled, ref_loss, atol=1e-5, rtol=1e-5), (loss_tiled, ref_loss)

    print("KERNEL_OK")
</pallas_src>

<mosaic_0001>
module attributes {stable_mosaic.version = 11 : i64} {
  func.func @_domain_classifier_kernel(%arg0: i32, %arg1: memref<20x32xf32, #tpu.memory_space<vmem>>, %arg2: memref<32x16xf32, #tpu.memory_space<vmem>>, %arg3: memref<1x16xf32, #tpu.memory_space<vmem>>, %arg4: memref<20x1xi32, #tpu.memory_space<vmem>>, %arg5: memref<1x1xf32, #tpu.memory_space<smem>>, %arg6: memref<1xf32, #tpu.memory_space<smem>>) attributes {dimension_semantics = [#tpu.dimension_semantics<arbitrary>], iteration_bounds = array<i64: 1>, scalar_prefetch = 0 : i64, scratch_operands = 1 : i64, tpu.core_type = #tpu.core_type<tc>, window_params = [{transform_indices = @transform_0, window_bounds = array<i64: 20, 32>}, {pipeline_mode = #tpu.pipeline_mode<synchronous>, transform_indices = @transform_1, window_bounds = array<i64: 32, 16>}, {pipeline_mode = #tpu.pipeline_mode<synchronous>, transform_indices = @transform_2, window_bounds = array<i64: 1, 16>}, {transform_indices = @transform_3, window_bounds = array<i64: 20, 1>}, {transform_indices = @transform_4, window_bounds = array<i64: 1, 1>}]} {
    %c0_i32 = arith.constant 0 : i32
    %0 = arith.cmpi eq, %arg0, %c0_i32 : i32
    %1 = arith.extui %0 : i1 to i32
    %c0_i32_0 = arith.constant 0 : i32
    %2 = arith.cmpi ne, %1, %c0_i32_0 : i32
    scf.if %2 {
      %cst_19 = arith.constant 0.000000e+00 : f32
      %c0_20 = arith.constant 0 : index
      %44 = memref.load %arg6[%c0_20] : memref<1xf32, #tpu.memory_space<smem>>
      memref.store %cst_19, %arg6[%c0_20] : memref<1xf32, #tpu.memory_space<smem>>
    } else {
    }
    %c0 = arith.constant 0 : index
    %c0_1 = arith.constant 0 : index
    %3 = vector.load %arg1[%c0, %c0_1] : memref<20x32xf32, #tpu.memory_space<vmem>>, vector<20x32xf32>
    %c0_2 = arith.constant 0 : index
    %c0_3 = arith.constant 0 : index
    %4 = vector.load %arg2[%c0_2, %c0_3] : memref<32x16xf32, #tpu.memory_space<vmem>>, vector<32x16xf32>
    %cst = arith.constant dense<0.000000e+00> : vector<20x16xf32>
    %5 = tpu.matmul %3, %4, %cst {dimension_numbers = #tpu.dot_dimension_numbers<[1], [0], [0], [1], [0, 0, 1, 1], [], []>} : vector<20x32xf32>, vector<32x16xf32>, vector<20x16xf32> -> vector<20x16xf32>
    %c0_4 = arith.constant 0 : index
    %c0_5 = arith.constant 0 : index
    %6 = vector.load %arg3[%c0_4, %c0_5] : memref<1x16xf32, #tpu.memory_space<vmem>>, vector<1x16xf32>
    %7 = vector.broadcast %6 : vector<1x16xf32> to vector<20x16xf32>
    %8 = arith.addf %5, %7 : vector<20x16xf32>
    %cst_6 = arith.constant dense<0xFF800000> : vector<20xf32>
    %9 = vector.multi_reduction <maximumf>, %8, %cst_6 [1] : vector<20x16xf32> to vector<20xf32>
    %10 = vector.shape_cast %9 : vector<20xf32> to vector<20x1xf32>
    %11 = vector.broadcast %10 : vector<20x1xf32> to vector<20x16xf32>
    %12 = arith.subf %8, %11 : vector<20x16xf32>
    %13 = math.exp %12 : vector<20x16xf32>
    %cst_7 = arith.constant dense<0.000000e+00> : vector<20xf32>
    %14 = vector.multi_reduction <add>, %13, %cst_7 [1] : vector<20x16xf32> to vector<20xf32>
    %15 = vector.shape_cast %14 : vector<20xf32> to vector<20x1xf32>
    %16 = tpu.iota {dimensions = array<i32: 1>} : vector<20x16xi32>
    %c0_8 = arith.constant 0 : index
    %c0_9 = arith.constant 0 : index
    %17 = vector.load %arg4[%c0_8, %c0_9] : memref<20x1xi32, #tpu.memory_space<vmem>>, vector<20x1xi32>
    %18 = vector.broadcast %17 : vector<20x1xi32> to vector<20x16xi32>
    %19 = arith.cmpi eq, %16, %18 : vector<20x16xi32>
    %cst_10 = arith.constant 0.000000e+00 : f32
    %20 = vector.broadcast %cst_10 : f32 to vector<20x16xf32>
    %21 = arith.select %19, %12, %20 : vector<20x16xi1>, vector<20x16xf32>
    %cst_11 = arith.constant dense<0.000000e+00> : vector<20xf32>
    %22 = vector.multi_reduction <add>, %21, %cst_11 [1] : vector<20x16xf32> to vector<20xf32>
    %23 = vector.shape_cast %22 : vector<20xf32> to vector<20x1xf32>
    %24 = math.log %15 : vector<20x1xf32>
    %25 = arith.subf %24, %23 : vector<20x1xf32>
    %c20_i32 = arith.constant 20 : i32
    %26 = arith.muli %arg0, %c20_i32 : i32
    %27 = tpu.iota {dimensions = array<i32: 0>} : vector<20x1xi32>
    %28 = vector.broadcast %26 : i32 to vector<20x1xi32>
    %29 = arith.addi %28, %27 : vector<20x1xi32>
    %c20_i32_12 = arith.constant 20 : i32
    %30 = vector.broadcast %c20_i32_12 : i32 to vector<20x1xi32>
    %31 = arith.cmpi slt, %29, %30 : vector<20x1xi32>
    %cst_13 = arith.constant 0.000000e+00 : f32
    %32 = vector.broadcast %cst_13 : f32 to vector<20x1xf32>
    %33 = arith.select %31, %25, %32 : vector<20x1xi1>, vector<20x1xf32>
    %c0_14 = arith.constant 0 : index
    %34 = memref.load %arg6[%c0_14] : memref<1xf32, #tpu.memory_space<smem>>
    %35 = vector.shape_cast %33 : vector<20x1xf32> to vector<1x20x1xf32>
    %cst_15 = arith.constant dense<0.000000e+00> : vector<1xf32>
    %36 = vector.multi_reduction <add>, %35, %cst_15 [1, 2] : vector<1x20x1xf32> to vector<1xf32>
    %37 = vector.shape_cast %36 : vector<1xf32> to vector<1x1x1xf32>
    %38 = vector.extract %37[0, 0, 0] : f32 from vector<1x1x1xf32>
    %39 = arith.addf %34, %38 : f32
    %c0_16 = arith.constant 0 : index
    %40 = memref.load %arg6[%c0_16] : memref<1xf32, #tpu.memory_space<smem>>
    memref.store %39, %arg6[%c0_16] : memref<1xf32, #tpu.memory_space<smem>>
    %c0_i32_17 = arith.constant 0 : i32
    %41 = arith.cmpi eq, %arg0, %c0_i32_17 : i32
    %42 = arith.extui %41 : i1 to i32
    %c0_i32_18 = arith.constant 0 : i32
    %43 = arith.cmpi ne, %42, %c0_i32_18 : i32
    scf.if %43 {
      %c0_19 = arith.constant 0 : index
      %44 = memref.load %arg6[%c0_19] : memref<1xf32, #tpu.memory_space<smem>>
      %cst_20 = arith.constant 5.000000e-02 : f32
      %45 = arith.mulf %44, %cst_20 : f32
      %c0_21 = arith.constant 0 : index
      %c0_22 = arith.constant 0 : index
      %46 = memref.load %arg5[%c0_21, %c0_22] : memref<1x1xf32, #tpu.memory_space<smem>>
      memref.store %45, %arg5[%c0_21, %c0_22] : memref<1x1xf32, #tpu.memory_space<smem>>
    } else {
    }
    return
  }
  func.func @transform_0(%arg0: i32) -> (i32, i32) {
    %c0_i32 = arith.constant 0 : i32
    %c0_i32_0 = arith.constant 0 : i32
    return %arg0, %c0_i32 : i32, i32
  }
  func.func @transform_1(%arg0: i32) -> (i32, i32) {
    %c0_i32 = arith.constant 0 : i32
    %c0_i32_0 = arith.constant 0 : i32
    %c0_i32_1 = arith.constant 0 : i32
    return %c0_i32, %c0_i32_0 : i32, i32
  }
  func.func @transform_2(%arg0: i32) -> (i32, i32) {
    %c0_i32 = arith.constant 0 : i32
    %c0_i32_0 = arith.constant 0 : i32
    %c0_i32_1 = arith.constant 0 : i32
    return %c0_i32, %c0_i32_0 : i32, i32
  }
  func.func @transform_3(%arg0: i32) -> (i32, i32) {
    %c0_i32 = arith.constant 0 : i32
    %c0_i32_0 = arith.constant 0 : i32
    return %arg0, %c0_i32 : i32, i32
  }
  func.func @transform_4(%arg0: i32) -> (i32, i32) {
    %c0_i32 = arith.constant 0 : i32
    %c0_i32_0 = arith.constant 0 : i32
    %c0_i32_1 = arith.constant 0 : i32
    return %c0_i32, %c0_i32_0 : i32, i32
  }
}

</mosaic_0001>

<bundles_post_ra>
// kernel: tpu_custom_call.1
= control target key start
LH: loop header
LB: loop body
LE: loop exit
PB: predicated region body
PF: predicated region fallthrough
CT: control target
= control target key end

     0   :  { %v316_v1 = vmov 0.0   ;;  %s390_s0 = inlined_call_operand.vmem [shape: f32[20,32], index: 0, kind: input, shape index: {}]   ;;  %s391_s1 = inlined_call_operand.vmem [shape: f32[32,16], index: 1, kind: input, shape index: {}]   ;;  %s392_s2 = inlined_call_operand.vmem [shape: f32[1,16], index: 2, kind: input, shape index: {}]   ;;  %s393_s3 = inlined_call_operand.vmem [shape: s32[20,1], index: 3, kind: input, shape index: {}]   ;;  %s394_s4 = inlined_call_operand.hbm [shape: f32[1,1], index: 4, kind: output, shape index: {}]  }
   0x1   :  { %v30_v0 = vld [vmem:[%s391_s1 + $0x18] sm:$0xff]  ;;  %261 = vmatprep.subr.mxu0 %v316_v1  ;;  %278 = vmatprep.subr.mxu1 %v316_v1  ;;  %v29_v2 = vld [vmem:[%s391_s1 + $0x10] sm:$0xff] }
   0x2   :  { %262 = vmatpush3.msra.mxu0 %v30_v0  ;;  %282 = vmatpush3.msra.mxu1 %v30_v0 }
   0x3   :  { %9 = vsyncpa [#allocation4], 0  ;;  %263 = vmatprep.subr.mxu0 %v316_v1  ;;  %279 = vmatprep.subr.mxu1 %v316_v1  ;;  %v28_v3 = vld [vmem:[%s391_s1 + $0x8] sm:$0xff]  ;;  %v27_v4 = vld [vmem:[%s391_s1] sm:$0xff]  ;;  %vm38_vm0 = vcmask 261120   ;;  %vm317_vm1 = vmmov 0   ;;  %v157_v34 = vlaneseq }
   0x4   :  { %264 = vmatpush3.msra.mxu0 %v29_v2  ;;  %283 = vmatpush3.msra.mxu1 %v29_v2  ;;  %v24_v5 = vld [vmem:[%s390_s0] sm:$0xff]  ;;  %v25_v6 = vld [vmem:[%s390_s0 + $0x8] sm:$0xff]  ;;  %v26_v7 = vld [vmem:[%s390_s0 + $0x10] sm:$0xf]  ;;  %v318_v8 = vmov 0   ;;  %vm128_vm2 = vcmask 130048  }
   0x5   :  { %265 = vmatprep.subr.mxu0 %v316_v1  ;;  %280 = vmatprep.subr.mxu1 %v316_v1  ;;  %v250_v9 = vld [vmem:[%s392_s2] ss:$0 sm:$0xff]  ;;  %vm135_vm3 = vcmask 125952   ;;  %v161_v23 = vld [vmem:[%s393_s3 + $0x10] sm:$0xf]  ;;  %v160_v24 = vld [vmem:[%s393_s3 + $0x8] sm:$0xff] }
   0x6   :  { %266 = vmatpush3.msra.mxu0 %v28_v3  ;;  %284 = vmatpush3.msra.mxu1 %v28_v3  ;;  %v159_v22 = vld [vmem:[%s393_s3] sm:$0xff]  ;;  %v158_v35 = vand.u32 127, %v157_v34  ;;  %v197_v55 = vshrl.u32 %v157_v34, 7  ;;  %vm211_vm8 = vcmask 7168   ;;  %vm215_vm9 = vcmask 3072   ;;  %s319_s9 = smov [#allocation3]  }
   0x7   :  { %267 = vmatprep.subr.mxu0 %v316_v1  ;;  %281 = vmatprep.subr.mxu1 %v316_v1 }
   0x8   :  { %268 = vmatpush3.msra.mxu0 %v27_v4  ;;  %285 = vmatpush3.msra.mxu1 %v27_v4  ;;  %v199_v59 = vadd.s32 16, %v197_v55 }
   0x9   :  { %269 = vmatprep.mubr.msk.f32.mxu0 %vm317_vm1, %v316_v1  ;;  %272 = vmatprep.mubr.msk.f32.mxu1 %vm317_vm1, %v316_v1 }
   0xa   :  { %270 = vmatmul.mubr.msk.f32.vlgmr.msra.gmra.mxu0 %vm38_vm0, %v24_v5  ;;  %273 = vmatmul.mubr.msk.f32.vlgmr.msra.gmra.mxu1 %vm38_vm0, %v25_v6  ;;  %vm206_vm7 = vcmp.lt.s32.totalorder %v199_v59, 20 }
   0xb   :  { %275 = vmatprep.mubr.msk.f32.mxu1 %vm317_vm1, %v316_v1  ;;  %292 = vset.pattern.permute.xlu1 %v318_v8 }
   0xc   :  { %293 = vset.pattern.permute.xlu0 %v318_v8 }
   0xe   :  { %276 = vmatmul.mubr.msk.f32.gmra.mxu1 %vm38_vm0, %v26_v7 }
  0xca   :  { %v114_v10 = vpop.f32.mrf.mxu0  ;;  %v119_v11 = vpop.f32.mrf.mxu1 }
  0xcb   :  { %v115_v12 = vadd.f32 %v250_v9, %v114_v10  ;;  %v120_v15 = vadd.f32 %v250_v9, %v119_v11 }
  0xcc   :  { %v271_v13 = vpop.f32.mrf.mxu0  ;;  %v274_v14 = vpop.f32.mrf.mxu1 }
  0xcd   :  { %v129_v16 = vsel %vm128_vm2, %v115_v12, -inf  ;;  %v132_v21 = vsel %vm128_vm2, %v120_v15, -inf }
  0xce   :  { %v124_v17 = vpop.f32.mrf.mxu1  ;;  %130 = vmax.xlane.f32.xlu0 %v129_v16 }
  0xcf   :  { %v125_v18 = vadd.f32 %v250_v9, %v124_v17 }
  0xd0   :  { %v277_v19 = vpop.f32.mrf.mxu1 }
  0xd1   :  { %v136_v20 = vsel %vm135_vm3, %v125_v18, -inf }
  0xd2   :  { %137 = vmax.xlane.f32.xlu1 %v136_v20  ;;  %133 = vmax.xlane.f32.xlu0 %v132_v21 }
  0xe3   :  { %163 = vperm.xlu1 %292, %v159_v22  }
  0xe7   :  { %169 = vperm.xlu1 %292, %v161_v23  }
  0xe8   :  { %166 = vperm.xlu0 %293, %v160_v24  }
 0x157   :  { %v131_v25 = vpop.xlane.xlu0 %130 }
 0x158   :  { %v139_v26 = vsub.f32 %v115_v12, %v131_v25 }
 0x15a   :  { %v142_v27 = vmul.f32 1.442695, %v139_v26 }
 0x15b   :  { %v138_v28 = vpop.xlane.xlu1 %137  ;;  %v134_v29 = vpop.xlane.xlu0 %133 }
 0x15c   :  { %294 = vpow2.f32 %v142_v27  ;;  %v141_v30 = vsub.f32 %v125_v18, %v138_v28  ;;  %v140_v31 = vsub.f32 %v120_v15, %v134_v29 }
 0x15e   :  { %v146_v32 = vmul.f32 1.442695, %v141_v30  ;;  %v144_v33 = vmul.f32 1.442695, %v140_v31 }
 0x15f   :  { %v164_v37 = vpop.permute.xlu1 %163 }
 0x160   :  { %296 = vpow2.f32 %v146_v32  ;;  %vm171_vm4 = vcmp.eq.s32.totalorder %v158_v35, %v164_v37 }
 0x161   :  { %298 = vpow2.f32 %v144_v33  ;;  %v174_v44 = vsel %vm171_vm4, %v139_v26, 0.0 }
 0x162   :  { %v177_v46 = vsel %vm128_vm2, %v174_v44, 0.0 }
 0x163   :  { %v167_v40 = vpop.permute.xlu0 %166  ;;  %v170_v45 = vpop.permute.xlu1 %169 }
 0x164   :  { %vm172_vm5 = vcmp.eq.s32.totalorder %v158_v35, %v167_v40  ;;  %vm173_vm6 = vcmp.eq.s32.totalorder %v158_v35, %v170_v45 }
 0x165   :  { %v175_v47 = vsel %vm172_vm5, %v140_v31, 0.0  ;;  %v176_v49 = vsel %vm173_vm6, %v141_v30, 0.0 }
 0x166   :  { %v180_v48 = vsel %vm128_vm2, %v175_v47, 0.0  ;;  %v183_v50 = vsel %vm135_vm3, %v176_v49, 0.0 }
 0x169   :  { %v295_v36 = vpop.eup %294 }
 0x16a   :  { %v148_v38 = vsel %vm128_vm2, %v295_v36, 0.0 }
 0x16b   :  { %149 = vadd.xlane.f32.xlu1 %v148_v38 }
 0x16d   :  { %v297_v39 = vpop.eup %296 }
 0x16e   :  { %v299_v41 = vpop.eup %298  ;;  %v154_v42 = vsel %vm135_vm3, %v297_v39, 0.0 }
 0x16f   :  { %155 = vadd.xlane.f32.xlu1 %v154_v42  ;;  %v151_v43 = vsel %vm128_vm2, %v299_v41, 0.0 }
 0x170   :  { %152 = vadd.xlane.f32.xlu0 %v151_v43 }
 0x173   :  { %178 = vadd.xlane.f32.xlu1 %v177_v46 }
 0x177   :  { %181 = vadd.xlane.f32.xlu1 %v180_v48 }
 0x17b   :  { %184 = vadd.xlane.f32.xlu1 %v183_v50 }
 0x1f4   :  { %v150_v51 = vpop.xlane.xlu1 %149 }
 0x1f5   :  { %300 = vlog2.f32 %v150_v51 }
 0x1f8   :  { %v156_v52 = vpop.xlane.xlu1 %155 }
 0x1f9   :  { %302 = vlog2.f32 %v156_v52  ;;  %v153_v53 = vpop.xlane.xlu0 %152 }
 0x1fa   :  { %304 = vlog2.f32 %v153_v53 }
 0x1fc   :  { %v179_v54 = vpop.xlane.xlu1 %178 }
 0x200   :  { %v182_v57 = vpop.xlane.xlu1 %181 }
 0x202   :  { %v301_v56 = vpop.eup %300 }
 0x203   :  { %v187_v58 = vmul.f32 0.6931472, %v301_v56 }
 0x204   :  { %v185_v1 = vpop.xlane.xlu1 %184 }
 0x205   :  { %v192_v63 = vsub.f32 %v187_v58, %v179_v54 }
 0x206   :  { %v303_v60 = vpop.eup %302 }
 0x207   :  { %v305_v61 = vpop.eup %304  ;;  %v191_v62 = vmul.f32 0.6931472, %v303_v60  ;;  %v212_v5 = vsel %vm211_vm8, %v192_v63, 0.0 }
 0x208   :  { %v189_v0 = vmul.f32 0.6931472, %v305_v61 }
 0x209   :  { %v194_v2 = vsub.f32 %v191_v62, %v185_v1 }
 0x20a   :  { %v193_v3 = vsub.f32 %v189_v0, %v182_v57 }
 0x20b   :  { %v209_v4 = vsel %vm206_vm7, %v194_v2, 0.0 }
 0x20c   :  { %v213_v6 = vsel %vm211_vm8, %v193_v3, 0.0  ;;  %v216_v7 = vsel %vm215_vm9, %v209_v4, 0.0 }
 0x20d   :  { %v214_v8 = vadd.f32 %v213_v6, %v212_v5 }
 0x20f   :  { %v217_v9 = vadd.f32 %v216_v7, %v214_v8 }
 0x211   :  { %218 = vadd.xlane.f32.xlu1 %v217_v9 }
 0x29a   :  { %v219_v10 = vpop.xlane.xlu1 %218 }
 0x29b   :  { %v220_v11 = vrot.slane %v219_v10, 4 }
 0x29d   :  { %v221_v12 = vadd.f32 %v220_v11, %v219_v10 }
 0x29f   :  { %v222_v13 = vrot.slane %v221_v12, 2 }
 0x2a1   :  { %v223_v14 = vadd.f32 %v222_v13, %v221_v12 }
 0x2a3   :  { %v224_v15 = vrot.slane %v223_v14, 1 }
 0x2a5   :  { %v225_v16 = vadd.f32 %v224_v15, %v223_v14 }
 0x2a7   :  { %286 = vpush %v225_v16 }
 0x2d8   :  { %s287_s3 = spop %286 }
 0x2d9   :  { %s234_s8 = smul.f32 0.05, %s287_s3 }
 0x2db   :  { %236 = sst [smem:[#allocation3]] %s234_s8 }
 0x2dc   :  { %244 = dma.smem_to_hbm %s319_s9, 16, %s394_s4, [#allocation4]  }
 0x2dd   :  { %314 = dma.done.wait [#allocation4], 16  }
 0x2de   :  { %315 = vsyncadd [#allocation4], 4294967280 }
 0x2df   :  { %248 = sfence }
 0x2e0   :  { %249 = vsyncpa [#allocation4], 1 }

</bundles_post_ra>
